<compile_context>
chip_gen: v7x
topology: tpu7x:2x2x1
jax: 0.10.0
libtpu: 0.0.40
codegen_flags: <defaults>
</compile_context>

<pallas_src>
import functools

import numpy as np
import jax
import jax.numpy as jnp
from jax.experimental import pallas as pl
from jax.experimental.pallas import tpu as pltpu

LN_EPS = 1e-5
_LANE = 128
_FUSE_BYTES_MAX = 64 << 20  # fuse per-tensor launches only when concat is cheap


def _cdiv(a, b):
    return (a + b - 1) // b


def _round_up(n, m):
    return _cdiv(n, m) * m


def _vmem_phys_bytes():
    try:
        return int(pltpu.get_tpu_info().vmem_capacity_bytes)
    except Exception:
        return 64 * 1024 * 1024  # conservative: v7x per-TensorCore VMEM


def _ln_proj_kernel(x_ref, w_ref, b_ref, o_ref):
    # x_ref: (tm, D) token rows (input dtype), pipelined per grid step
    # w_ref: (D, P)  gamma-folded projection, bf16, whole array resident in VMEM
    # b_ref: (1, P)  beta @ proj, f32, resident in VMEM
    # o_ref: (tm, P) output tile
    x = x_ref[...].astype(jnp.float32)
    # One-pass LN stats: sum and sum-of-squares are independent reductions.
    mean = jnp.mean(x, axis=-1, keepdims=True)
    mean_sq = jnp.mean(x * x, axis=-1, keepdims=True)
    var = jnp.maximum(mean_sq - mean * mean, 0.0)
    s = jax.lax.rsqrt(var + LN_EPS)          # per-row scale
    xn = x * s + (-mean * s)                 # normalized rows
    acc = jnp.dot(
        xn.astype(w_ref.dtype), w_ref[...], preferred_element_type=jnp.float32
    )
    o_ref[...] = (acc + b_ref[...]).astype(o_ref.dtype)


@functools.partial(jax.jit, static_argnames=("tm", "out_dtype"))
def ln_proj(x_rows, w_folded, bias_folded, *, tm=None, out_dtype=None):
    """x_rows: (R, D) rows -> (R, P_pad) = LayerNorm(x) @ W' + b' (lane-padded P)."""
    R, D = x_rows.shape
    P = w_folded.shape[1]
    out_dtype = x_rows.dtype if out_dtype is None else np.dtype(out_dtype)

    vmem_phys = _vmem_phys_bytes()
    vmem_cap = int(vmem_phys * 0.8)  # headroom for Mosaic internal scratch

    if tm is None:
        # Bigger row tiles on 128 MiB-VMEM parts (v5e/v6e); 256 on v7x.
        tm = 512 if vmem_phys >= 96 * 1024 * 1024 else 256

    # Shrink the row tile for tiny launches (sublane-aligned).
    tm_eff = min(tm, _round_up(R, 8))
    # Keep >= 2 grid steps so the single "parallel" axis can be sharded
    # across v7x's two TensorCores (harmless elsewhere).
    if R > 16 and _cdiv(R, tm_eff) < 2:
        tm_eff = max(8, _round_up(_cdiv(R, 2), 8))

    out_itemsize = np.dtype(out_dtype).itemsize

    def vmem_needed(t):
        return (
            2 * t * D * x_rows.dtype.itemsize          # x tiles, double-buffered
            + D * P * w_folded.dtype.itemsize          # weight, single copy
            + P * bias_folded.dtype.itemsize           # bias, single copy
            + 2 * t * P * out_itemsize                 # out tiles, double-buffered
            + (2 << 20)                                # slack
        )

    # Never silently exceed the budget: shrink tm instead.
    while vmem_needed(tm_eff) > vmem_cap and tm_eff > 8:
        tm_eff = max(8, _round_up(tm_eff // 2, 8))

    grid = (_cdiv(R, tm_eff),)  # ragged last block: OOB reads padded, stores masked
    vmem_limit = int(min(max(vmem_needed(tm_eff), 32 * 1024 * 1024), vmem_cap))

    return pl.pallas_call(
        _ln_proj_kernel,
        out_shape=jax.ShapeDtypeStruct((R, P), out_dtype),
        grid_spec=pltpu.PrefetchScalarGridSpec(
            num_scalar_prefetch=0,
            grid=grid,
            in_specs=[
                pl.BlockSpec((tm_eff, D), lambda i: (i, 0)),        # token rows
                pl.BlockSpec(memory_space=pltpu.MemorySpace.VMEM),  # folded proj (bf16)
                pl.BlockSpec(memory_space=pltpu.MemorySpace.VMEM),  # folded bias (f32)
            ],
            out_specs=pl.BlockSpec((tm_eff, P), lambda i: (i, 0)),
        ),
        compiler_params=pltpu.CompilerParams(
            dimension_semantics=("parallel",),   # row tiles independent -> megacore
            vmem_limit_bytes=vmem_limit,
        ),
    )(x_rows, w_folded, bias_folded)


def prepare_params(gamma, beta, proj, *, mxu_dtype=jnp.bfloat16):
    """Fold LN affine into the projection and pad P to a lane-dense multiple of 128."""
    gamma = jnp.asarray(gamma).reshape(-1).astype(jnp.float32)
    beta = jnp.asarray(beta).reshape(-1).astype(jnp.float32)
    proj = jnp.asarray(proj).astype(jnp.float32)
    D, P = proj.shape
    w = gamma[:, None] * proj                     # (D, P)
    b = (beta @ proj)[None, :]                    # (1, P)
    P_pad = _round_up(max(P, _LANE), _LANE)
    if P_pad != P:
        w = jnp.pad(w, ((0, 0), (0, P_pad - P)))
        b = jnp.pad(b, ((0, 0), (0, P_pad - P)))
    return w.astype(mxu_dtype), b, P


def linear_layer_forward(tokens, gamma, beta, proj, *, tm=None):
    """Pallas equivalent of LinearLayer.forward for a list of 3-D token tensors."""
    # TODO(synk): the non-3D branch of the PyTorch module (self.fc path) hits
    # `assert 1 == 2` and is dead code; it is intentionally not implemented.
    w_folded, bias_folded, P = prepare_params(gamma, beta, proj)
    D = proj.shape[0]

    shapes, rows_list = [], []
    for t in tokens:
        assert t.ndim == 3, "only the 3-D (ViT) path is implemented"
        B, N, Dt = t.shape
        assert Dt == D, "all token tensors must share ln/proj feature dim"
        shapes.append((B, N))
        # LN+proj over ALL N rows (CLS included: ~1/N extra compute), then drop
        # the CLS output row — avoids a full pre-kernel HBM copy of the slice.
        rows_list.append(t.reshape(B * N, D))

    if not rows_list:
        return []

    total_bytes = sum(r.shape[0] for r in rows_list) * D * rows_list[0].dtype.itemsize
    fuse = len(rows_list) > 1 and total_bytes <= _FUSE_BYTES_MAX

    outs = []
    if fuse:
        # One launch for all small tensors: amortizes dispatch + weight DMA.
        rows = jnp.concatenate(rows_list, axis=0)
        y = ln_proj(rows, w_folded, bias_folded, tm=tm)
        off = 0
        for (B, N) in shapes:
            r = B * N
            outs.append(y[off:off + r].reshape(B, N, -1)[:, 1:, :P])
            off += r
    else:
        for rows, (B, N) in zip(rows_list, shapes):
            y = ln_proj(rows, w_folded, bias_folded, tm=tm)
            outs.append(y.reshape(B, N, -1)[:, 1:, :P])
    return outs


if __name__ == "__main__":
    key = jax.random.PRNGKey(0)
    k_x0, k_x1, k_proj = jax.random.split(key, 3)

    B, N, D, P = 2, 17, 64, 32  # N includes the CLS token; N-1 = 16 tokens kept

    tokens = [
        jax.random.normal(k_x0, (B, N, D), dtype=jnp.float32),
        jax.random.normal(k_x1, (B, N, D), dtype=jnp.float32),
    ]

    # ln_post parameters (nn.LayerNorm defaults) and CLIP-style projection.
    gamma = jnp.ones((D,), dtype=jnp.float32)
    beta = jnp.zeros((D,), dtype=jnp.float32)
    proj = (D ** -0.5) * jax.random.normal(k_proj, (D, P), dtype=jnp.float32)

    outs = linear_layer_forward(tokens, gamma, beta, proj)
    outs = [jax.block_until_ready(o) for o in outs]

    # Reference check in plain f32 JAX (matmul runs in bf16 on the MXU, so
    # tolerance is loosened accordingly; accumulation stays f32).
    for t, o in zip(tokens, outs):
        xb = t[:, 1:, :].astype(jnp.float32)
        mu = xb.mean(-1, keepdims=True)
        var = ((xb - mu) ** 2).mean(-1, keepdims=True)
        ref = ((xb - mu) * jax.lax.rsqrt(var + LN_EPS) * gamma + beta) @ proj
        assert o.shape == (B, N - 1, P)
        err = float(jnp.max(jnp.abs(o - ref)))
        assert jnp.allclose(o, ref, atol=5e-2, rtol=5e-2), f"max abs err {err}"

    print("KERNEL_OK")
</pallas_src>

<mosaic_0001>
module attributes {stable_mosaic.version = 11 : i64} {
  func.func @_ln_proj_kernel(%arg0: i32, %arg1: memref<40x64xf32, #tpu.memory_space<vmem>>, %arg2: memref<64x128xbf16, #tpu.memory_space<vmem>>, %arg3: memref<1x128xf32, #tpu.memory_space<vmem>>, %arg4: memref<40x128xf32, #tpu.memory_space<vmem>>) attributes {dimension_semantics = [#tpu.dimension_semantics<parallel>], iteration_bounds = array<i64: 2>, scalar_prefetch = 0 : i64, scratch_operands = 0 : i64, tpu.core_type = #tpu.core_type<tc>, window_params = [{transform_indices = @transform_0, window_bounds = array<i64: 40, 64>}, {pipeline_mode = #tpu.pipeline_mode<synchronous>, transform_indices = @transform_1, window_bounds = array<i64: 64, 128>}, {pipeline_mode = #tpu.pipeline_mode<synchronous>, transform_indices = @transform_2, window_bounds = array<i64: 1, 128>}, {transform_indices = @transform_3, window_bounds = array<i64: 40, 128>}]} {
    %c0 = arith.constant 0 : index
    %c0_0 = arith.constant 0 : index
    %0 = vector.load %arg1[%c0, %c0_0] : memref<40x64xf32, #tpu.memory_space<vmem>>, vector<40x64xf32>
    %cst = arith.constant dense<0.000000e+00> : vector<40xf32>
    %1 = vector.multi_reduction <add>, %0, %cst [1] : vector<40x64xf32> to vector<40xf32>
    %2 = vector.shape_cast %1 : vector<40xf32> to vector<40x1xf32>
    %cst_1 = arith.constant 6.400000e+01 : f32
    %3 = vector.broadcast %cst_1 : f32 to vector<40x1xf32>
    %4 = arith.divf %2, %3 : vector<40x1xf32>
    %5 = arith.mulf %0, %0 : vector<40x64xf32>
    %cst_2 = arith.constant dense<0.000000e+00> : vector<40xf32>
    %6 = vector.multi_reduction <add>, %5, %cst_2 [1] : vector<40x64xf32> to vector<40xf32>
    %7 = vector.shape_cast %6 : vector<40xf32> to vector<40x1xf32>
    %cst_3 = arith.constant 6.400000e+01 : f32
    %8 = vector.broadcast %cst_3 : f32 to vector<40x1xf32>
    %9 = arith.divf %7, %8 : vector<40x1xf32>
    %10 = arith.mulf %4, %4 : vector<40x1xf32>
    %11 = arith.subf %9, %10 : vector<40x1xf32>
    %cst_4 = arith.constant 0.000000e+00 : f32
    %12 = vector.broadcast %cst_4 : f32 to vector<40x1xf32>
    %13 = arith.maximumf %11, %12 : vector<40x1xf32>
    %cst_5 = arith.constant 9.99999974E-6 : f32
    %14 = vector.broadcast %cst_5 : f32 to vector<40x1xf32>
    %15 = arith.addf %13, %14 : vector<40x1xf32>
    %16 = math.rsqrt %15 : vector<40x1xf32>
    %17 = vector.broadcast %16 : vector<40x1xf32> to vector<40x64xf32>
    %18 = arith.mulf %0, %17 : vector<40x64xf32>
    %cst_6 = arith.constant 0.000000e+00 : f32
    %19 = vector.broadcast %cst_6 : f32 to vector<40x1xf32>
    %20 = arith.subf %19, %4 : vector<40x1xf32>
    %21 = arith.mulf %20, %16 : vector<40x1xf32>
    %22 = vector.broadcast %21 : vector<40x1xf32> to vector<40x64xf32>
    %23 = arith.addf %18, %22 : vector<40x64xf32>
    %24 = arith.truncf %23 : vector<40x64xf32> to vector<40x64xbf16>
    %c0_7 = arith.constant 0 : index
    %c0_8 = arith.constant 0 : index
    %25 = vector.load %arg2[%c0_7, %c0_8] : memref<64x128xbf16, #tpu.memory_space<vmem>>, vector<64x128xbf16>
    %cst_9 = arith.constant dense<0.000000e+00> : vector<40x128xf32>
    %26 = tpu.matmul %24, %25, %cst_9 {dimension_numbers = #tpu.dot_dimension_numbers<[1], [0], [0], [1], [0, 0, 1, 1], [], []>} : vector<40x64xbf16>, vector<64x128xbf16>, vector<40x128xf32> -> vector<40x128xf32>
    %c0_10 = arith.constant 0 : index
    %c0_11 = arith.constant 0 : index
    %27 = vector.load %arg3[%c0_10, %c0_11] : memref<1x128xf32, #tpu.memory_space<vmem>>, vector<1x128xf32>
    %28 = vector.broadcast %27 : vector<1x128xf32> to vector<40x128xf32>
    %29 = arith.addf %26, %28 : vector<40x128xf32>
    %c0_12 = arith.constant 0 : index
    %c0_13 = arith.constant 0 : index
    %30 = vector.load %arg4[%c0_12, %c0_13] : memref<40x128xf32, #tpu.memory_space<vmem>>, vector<40x128xf32>
    tpu.vector_store %arg4[%c0_12, %c0_13], %29 {strides = array<i32>} : memref<40x128xf32, #tpu.memory_space<vmem>>, vector<40x128xf32>,
    return
  }
  func.func @transform_0(%arg0: i32) -> (i32, i32) {
    %c0_i32 = arith.constant 0 : i32
    %c0_i32_0 = arith.constant 0 : i32
    return %arg0, %c0_i32 : i32, i32
  }
  func.func @transform_1(%arg0: i32) -> (i32, i32) {
    %c0_i32 = arith.constant 0 : i32
    %c0_i32_0 = arith.constant 0 : i32
    %c0_i32_1 = arith.constant 0 : i32
    return %c0_i32, %c0_i32_0 : i32, i32
  }
  func.func @transform_2(%arg0: i32) -> (i32, i32) {
    %c0_i32 = arith.constant 0 : i32
    %c0_i32_0 = arith.constant 0 : i32
    %c0_i32_1 = arith.constant 0 : i32
    return %c0_i32, %c0_i32_0 : i32, i32
  }
  func.func @transform_3(%arg0: i32) -> (i32, i32) {
    %c0_i32 = arith.constant 0 : i32
    %c0_i32_0 = arith.constant 0 : i32
    return %arg0, %c0_i32 : i32, i32
  }
}

</mosaic_0001>

<bundles_post_ra>
// kernel: ln_proj.1
= control target key start
LH: loop header
LB: loop body
LE: loop exit
PB: predicated region body
PF: predicated region fallthrough
CT: control target
= control target key end

     0   :  { %8 = vsyncpa [#allocation3], 0  ;;  %s887_s0 = inlined_call_operand.vmem [shape: f32[68,64], index: 0, kind: input, shape index: {}]   ;;  %s888_s1 = inlined_call_operand.vmem [shape: bf16[64,128], index: 1, kind: input, shape index: {}]   ;;  %s889_s2 = inlined_call_operand.vmem [shape: f32[1,128], index: 2, kind: input, shape index: {}]   ;;  %s890_s3 = inlined_call_operand.hbm [shape: f32[68,128], index: 3, kind: output, shape index: {}]  }
   0x1   :  { %10 = vsyncpa [#allocation3 + $0x1], 0  ;;  %s690_s12 = smov 0   ;;  %s692_s13 = smov 0  }
   0x2   :  { %s694_s14 = smov 0   ;;  %s696_s15 = smov 0  }
   0x3 LB: > { %s711_s16 = sadd.s32 4294967295, %s663_s15   ;;  %s488_s17 = sadd.s32 4294967294, %s663_s15   ;;  %s663_s15 = sphi %s696_s15, %s896_s15   ;;  %s659_s14 = sphi %s694_s14, %s895_s14   ;;  %s655_s13 = sphi %s692_s13, %s894_s13   ;;  %s651_s12 = sphi %s690_s12, %s893_s12  }
   0x4   : > { %s715_s18 = sadd.s32 1, %s663_s15   ;;  %s91_s19 = sadd.s32 1, %s659_s14 }
   0x5   : > { %s88_s20 = ssub.s32 %s663_s15, %s715_s18  ;;  %p101_p0 = scmp.ne.s32.totalorder %s659_s14, %s655_s13 }
   0x6   : > { %p89_p1 = scmp.eq.s32.totalorder %s88_s20, 0  ;;  %p102_p2 = scmp.eq.s32.totalorder %s711_s16, 1 }
   0x7   : > { %p107_p3 = scmp.ne.s32.totalorder %s655_s13, %s651_s12  ;;  %p108_p4 = scmp.eq.s32.totalorder %s488_s17, 1 }
   0x8   : > { %s726_s21 = scalar_select %p89_p1, %s659_s14, %s91_s19  }
   0x9   : > { %p728_p5 = por %p102_p2, %p101_p0  ;;  %p732_p6 = por %p108_p4, %p107_p3 }
   0xa   : > { %p491_p7 = scmp.ge.s32.totalorder %s663_s15, 1  ;;  %p149_p8 = scmp.lt.s32.totalorder %s663_s15, 3 }
   0xc   : > { %p150_p9 = pnand %p491_p7, %p149_p8 }
   0xd   : > { %s739_s24 = smul.u32 (!%p150_p9), 5, %s711_s16  ;;  %vm202_vm0 = vcmask (!%p150_p9), 523264   ;;  %v587_v20 = vld [vmem:[%s888_s1] sm:$0xff] (!%p150_p9)   ;;  %v665_v21 = vmov (!%p150_p9), 0.0   ;;  %v588_v22 = vld [vmem:[%s888_s1 + $0x8] sm:$0xff] (!%p150_p9)   ;;  %v589_v23 = vld [vmem:[%s888_s1 + $0x10] sm:$0xff] (!%p150_p9)  }
   0xe   : > { %153 = sbr.rel (%p150_p9) target bundleno = 456 (0x1c8), region = 32  ;;  %536 = vmatprep.subr.bf16.mxu1 (!%p150_p9), %v665_v21  ;;  %516 = vmatprep.subr.bf16.mxu0 (!%p150_p9), %v665_v21  ;;  %vm666_vm1 = vmmov (!%p150_p9), 0   ;;  %v590_v24 = vld [vmem:[%s888_s1 + $0x18] sm:$0xff] (!%p150_p9)   ;;  %s174_s11 = sand.u32 (!%p150_p9), 1, %s655_s13  }
   0xf   : > { %p182_p10 = scmp.lt.s32.totalorder (!%p150_p9), %s739_s24, 8  ;;  %540 = vmatpush3.bf16.msra.mxu1 (!%p150_p9), %v587_v20  ;;  %517 = vmatpush3.bf16.msra.mxu0 (!%p150_p9), %v587_v20  ;;  %s544_s17 = smul.u32 (!%p150_p9), 40, %s174_s11 }
  0x10   : > { %537 = vmatprep.subr.bf16.mxu1 (!%p150_p9), %v665_v21  ;;  %518 = vmatprep.subr.bf16.mxu0 (!%p150_p9), %v665_v21 }
  0x11   : > { %528 = vmatprep.mubr.msk.bf16.mxu1 (!%p150_p9), %vm666_vm1, %v665_v21  ;;  %524 = vmatprep.mubr.msk.bf16.mxu0 (!%p150_p9), %vm666_vm1, %v665_v21 }
  0x13   : > { %541 = vmatpush3.bf16.msra.mxu1 (!%p150_p9), %v588_v22  ;;  %519 = vmatpush3.bf16.msra.mxu0 (!%p150_p9), %v588_v22 }
  0x14   : > { %538 = vmatprep.subr.bf16.mxu1 (!%p150_p9), %v665_v21  ;;  %520 = vmatprep.subr.bf16.mxu0 (!%p150_p9), %v665_v21 }
  0x15   : > { %s183_s25 = scalar_select %p182_p10, %s739_s24, 8 }
  0x16   : > { %s415_s27 = ssub.s32 (%p728_p5), 9, %s739_s24 }
  0x17   : > { %s492_s26 = sshll.u32 %s183_s25, 3  ;;  %542 = vmatpush3.bf16.msra.mxu1 %v589_v23  ;;  %521 = vmatpush3.bf16.msra.mxu0 %v589_v23  ;;  %s819_s25 = scalar_lea.vmem [#allocation2], %s544_s17 }
  0x18   : > { %s185_s29 = scalar_lea.vmem %s887_s0, %s492_s26  ;;  %539 = vmatprep.subr.bf16.mxu1 %v665_v21  ;;  %522 = vmatprep.subr.bf16.mxu0 %v665_v21  ;;  %s826_s26 = scalar_lea.sflag [#allocation3], %s174_s11 }
  0x19   : > { %v746_v0 = vld [vmem:[%s185_s29 + $0x10] sm:$0xff]  ;;  %v748_v1 = vld [vmem:[%s185_s29 + $0x8] sm:$0xff]  ;;  %v750_v2 = vld [vmem:[%s185_s29 + $0x18] sm:$0xff]  ;;  %p416_p11 = scmp.lt.s32.totalorder (%p728_p5), %s415_s27, 5 }
  0x1a   : > { %v209_v3 = vsel %vm202_vm0, %v746_v0, 0.0  ;;  %v206_v4 = vsel %vm202_vm0, %v748_v1, 0.0  ;;  %v226_v5 = vmul.f32 %v746_v0, %v746_v0  ;;  %v212_v6 = vsel %vm202_vm0, %v750_v2, 0.0  ;;  %v763_v9 = vld [vmem:[%s185_s29] sm:$0xff] }
  0x1b   : > { %210 = vadd.xlane.f32.xlu0 %v209_v3  ;;  %207 = vadd.xlane.f32.xlu1 %v206_v4  ;;  %v227_v8 = vmul.f32 %v750_v2, %v750_v2  ;;  %v203_v11 = vsel %vm202_vm0, %v763_v9, 0.0  ;;  %v224_v12 = vmul.f32 %v763_v9, %v763_v9  ;;  %v770_v13 = vld [vmem:[%s185_s29 + $0x20] sm:$0xff]  ;;  %v225_v17 = vmul.f32 %v748_v1, %v748_v1 }
  0x1c   : > { %v235_v7 = vsel %vm202_vm0, %v226_v5, 0.0  ;;  %v215_v15 = vsel %vm202_vm0, %v770_v13, 0.0  ;;  %v228_v16 = vmul.f32 %v770_v13, %v770_v13  ;;  %543 = vmatpush3.bf16.msra.mxu1 %v590_v24  ;;  %523 = vmatpush3.bf16.msra.mxu0 %v590_v24 }
  0x1d   : > { %v238_v10 = vsel %vm202_vm0, %v227_v8, 0.0  ;;  %v229_v14 = vsel %vm202_vm0, %v224_v12, 0.0  ;;  %v232_v19 = vsel %vm202_vm0, %v225_v17, 0.0 }
  0x1e   : > { %v241_v18 = vsel %vm202_vm0, %v228_v16, 0.0 }
  0x1f   : > { %213 = vadd.xlane.f32.xlu0 %v212_v6  ;;  %236 = vadd.xlane.f32.xlu1 %v235_v7 }
  0x23   : > { %239 = vadd.xlane.f32.xlu1 %v238_v10  ;;  %204 = vadd.xlane.f32.xlu0 %v203_v11 }
  0x27   : > { %230 = vadd.xlane.f32.xlu1 %v229_v14  ;;  %216 = vadd.xlane.f32.xlu0 %v215_v15 }
  0x2b   : > { %242 = vadd.xlane.f32.xlu1 %v241_v18  ;;  %233 = vadd.xlane.f32.xlu0 %v232_v19 }
  0xa8   : > { %v211_v25 = vpop.xlane.xlu0 %210  ;;  %v208_v26 = vpop.xlane.xlu1 %207 }
  0xa9   : > { %v221_v27 = vmul.f32 0.015625, %v211_v25  ;;  %v220_v42 = vmul.f32 0.015625, %v208_v26 }
  0xab   : > { %v251_v30 = vmul.f32 %v221_v27, %v221_v27  ;;  %v250_v51 = vmul.f32 %v220_v42, %v220_v42  ;;  %v281_v5 = vsub.f32 0.0, %v221_v27  ;;  %v280_v22 = vsub.f32 0.0, %v220_v42 }
  0xac   : > { %v214_v28 = vpop.xlane.xlu0 %213  ;;  %v237_v29 = vpop.xlane.xlu1 %236 }
  0xad   : > { %v222_v31 = vmul.f32 0.015625, %v214_v28  ;;  %v246_v32 = vmul.f32 0.015625, %v237_v29 }
  0xaf   : > { %v256_v33 = vsub.f32 %v246_v32, %v251_v30  ;;  %v252_v36 = vmul.f32 %v222_v31, %v222_v31  ;;  %v282_v6 = vsub.f32 0.0, %v222_v31 }
  0xb0   : > { %v240_v34 = vpop.xlane.xlu1 %239  ;;  %v205_v35 = vpop.xlane.xlu0 %204 }
  0xb1   : > { %v261_v37 = vmax.f32 %v256_v33, 0.0  ;;  %v247_v38 = vmul.f32 0.015625, %v240_v34  ;;  %v219_v39 = vmul.f32 0.015625, %v205_v35 }
  0xb3   : > { %v266_v40 = vadd.f32 1e-05, %v261_v37  ;;  %v257_v41 = vsub.f32 %v247_v38, %v252_v36  ;;  %v249_v43 = vmul.f32 %v219_v39, %v219_v39  ;;  %v279_v18 = vsub.f32 0.0, %v219_v39 }
  0xb4   : > { %v231_v44 = vpop.xlane.xlu1 %230  ;;  %v217_v45 = vpop.xlane.xlu0 %216 }
  0xb5   : > { %591 = vrsqrt.f32 %v266_v40  ;;  %v262_v46 = vmax.f32 %v257_v41, 0.0  ;;  %v244_v47 = vmul.f32 0.015625, %v231_v44  ;;  %v223_v48 = vmul.f32 0.015625, %v217_v45 }
  0xb7   : > { %v267_v49 = vadd.f32 1e-05, %v262_v46  ;;  %v254_v50 = vsub.f32 %v244_v47, %v249_v43  ;;  %v253_v52 = vmul.f32 %v223_v48, %v223_v48  ;;  %v283_v19 = vsub.f32 0.0, %v223_v48 }
  0xb8   : > { %v243_v53 = vpop.xlane.xlu1 %242  ;;  %v234_v54 = vpop.xlane.xlu0 %233 }
  0xb9   : > { %593 = vrsqrt.f32 %v267_v49  ;;  %v259_v55 = vmax.f32 %v254_v50, 0.0  ;;  %v248_v56 = vmul.f32 0.015625, %v243_v53  ;;  %v245_v57 = vmul.f32 0.015625, %v234_v54 }
  0xbb   : > { %v264_v58 = vadd.f32 1e-05, %v259_v55  ;;  %v258_v59 = vsub.f32 %v248_v56, %v253_v52  ;;  %v255_v60 = vsub.f32 %v245_v57, %v250_v51 }
  0xbd   : > { %v263_v61 = vmax.f32 %v258_v59, 0.0  ;;  %v260_v62 = vmax.f32 %v255_v60, 0.0  ;;  %595 = vrsqrt.f32 %v264_v58 }
  0xbf   : > { %v592_v63 = vpop.eup %591  ;;  %v268_v3 = vadd.f32 1e-05, %v263_v61  ;;  %v265_v4 = vadd.f32 1e-05, %v260_v62 }
  0xc0   : > { %v276_v7 = vmul.f32 %v592_v63, %v746_v0  ;;  %v286_v8 = vmul.f32 %v592_v63, %v281_v5 }
  0xc1   : > { %597 = vrsqrt.f32 %v268_v3 }
  0xc2   : > { %599 = vrsqrt.f32 %v265_v4  ;;  %v291_v14 = vadd.f32 %v286_v8, %v276_v7 }
  0xc3   : > { %v594_v10 = vpop.eup %593 }
  0xc4   : > { %v277_v11 = vmul.f32 %v594_v10, %v750_v2  ;;  %v287_v12 = vmul.f32 %v594_v10, %v282_v6 }
  0xc6   : > { %v292_v15 = vadd.f32 %v287_v12, %v277_v11 }
  0xc7   : > { %v596_v16 = vpop.eup %595 }
  0xc8   : > { %v295_v17 = vpack.c.bf16 %v292_v15, %v291_v14  ;;  %v274_v0 = vmul.f32 %v596_v16, %v763_v9  ;;  %v284_v23 = vmul.f32 %v596_v16, %v279_v18  ;;  %v493_v9 = vld [vmem:[%s889_s2] ss:$0 sm:$0xff] }
  0xca   : > { %529 = vmatmul.mubr.msk.bf16.vlgmr.msra.gmra.mrb[0].mxu1 %vm202_vm0, %v295_v17  ;;  %v289_v29 = vadd.f32 %v284_v23, %v274_v0 }
  0xcb   : > { %v598_v20 = vpop.eup %597  ;;  %532 = vmatprep.mubr.msk.bf16.mxu1 %vm666_vm1, %v665_v21 }
  0xcc   : > { %v600_v24 = vpop.eup %599  ;;  %v278_v2 = vmul.f32 %v598_v20, %v770_v13  ;;  %v288_v25 = vmul.f32 %v598_v20, %v283_v19 }
  0xcd   : > { %v275_v26 = vmul.f32 %v600_v24, %v748_v1  ;;  %v285_v27 = vmul.f32 %v600_v24, %v280_v22 }
  0xce   : > { %v293_v28 = vadd.f32 %v288_v25, %v278_v2 }
  0xcf   : > { %v290_v30 = vadd.f32 %v285_v27, %v275_v26 }
  0xd0   : > { %v296_v31 = vpack.c.bf16 %v293_v28, %v293_v28 }
  0xd1   : > { %v294_v32 = vpack.c.bf16 %v290_v30, %v289_v29 }
  0xd2   : > { %533 = vmatmul.mubr.msk.bf16.gmra.mrb[4].mxu1 %vm202_vm0, %v296_v31 }
  0xd3   : > { %525 = vmatmul.mubr.msk.bf16.vlgmr.msra.gmra.mrb[0].mxu0 %vm202_vm0, %v294_v32 }
 0x19d   : > { %v387_v13 = vpop.f32.mrb[0].mxu1 }
 0x19e   : > { %v388_v21 = vadd.f32 %v493_v9, %v387_v13  ;;  %v530_v33 = vpop.f32.mrb[1].mxu1 }
 0x19f   : > { %v390_v1 = vpop.f32.mrb[2].mxu1 }
 0x1a0   : > { %403 = vst [vmem:[%s819_s25 + $0x10] sm:$0xff] %v388_v21  ;;  %v391_v34 = vadd.f32 %v493_v9, %v390_v1  ;;  %v531_v35 = vpop.f32.mrb[3].mxu1 }
 0x1a2   : > { %404 = vst [vmem:[%s819_s25 + $0x18] sm:$0xff] %v391_v34 }
 0x1a5   : > { %v395_v36 = vpop.f32.mrb[4].mxu1  ;;  %413 = sbr.rel (!%p728_p5) target bundleno = 456 (0x1c8), region = 36 }
 0x1a6   : > { %v379_v37 = vpop.f32.mrb[0].mxu0  ;;  %v396_v38 = vadd.f32 %v493_v9, %v395_v36  ;;  %v534_v39 = vpop.f32.mrb[5].mxu1 }
 0x1a7   : > { %v380_v40 = vadd.f32 %v493_v9, %v379_v37  ;;  %v526_v41 = vpop.f32.mrb[1].mxu0  ;;  %v398_v42 = vpop.f32.mrb[6].mxu1 }
 0x1a8   : > { %405 = vst [vmem:[%s819_s25 + $0x20] sm:$0xff] %v396_v38  ;;  %v382_v43 = vpop.f32.mrb[2].mxu0  ;;  %v535_v44 = vpop.f32.mrb[7].mxu1 }
 0x1a9   : > { %401 = vst [vmem:[%s819_s25] sm:$0xff] %v380_v40  ;;  %v383_v45 = vadd.f32 %v493_v9, %v382_v43  ;;  %v527_v46 = vpop.f32.mrb[3].mxu0 }
 0x1ab   : > { %402 = vst [vmem:[%s819_s25 + $0x8] sm:$0xff] %v383_v45 }
 0x1ac   : > { %s898_s27 = smov (!%p416_p11, %s415_s27), 5 }
 0x1ad   : > { %s831_s28 = sshll.u32 %s898_s27, 7 }
 0x1ae   : > { %s420_s29 = ssub.s32 640, %s831_s28 }
 0x1af   : > { %421 = vsyncadd %s826_s26, %s420_s29  ;;  %p502_p12 = scmp.ne.s32.totalorder %s831_s28, 0  ;;  %s508_s30 = smul.u32 640, %s711_s16 }
 0x1b0   : > { %s426_s4 = sshll.u32 %s819_s25, 4  ;;  %s667_s7 = smov [#allocation2]   ;;  %s843_s4 = int_to_ptr.vmem [resolvable:$true] %s426_s4 }
 0x1b1   : > { %s841_s6 = scalar_lea.hbm %s890_s3, %s508_s30  ;;  %s601_s24 = scalar_lea.vmem %s843_s4, %s831_s28 }
 0x1b2   : > { %p602_p13 = scmp.ne.s32.totalorder %s843_s4, %s601_s24  ;;  %s605_s8 = sshll.u32 %s667_s7, 4  ;;  %s606_s8 = int_to_ptr.vmem [resolvable:$false] %s605_s8 }
 0x1b3   : > { %s607_s16 = scalar_lea.vmem %s606_s8, 1280  ;;  %p608_p2 = scmp.lt.s32.totalorder %s843_s4, %s606_s8 }
 0x1b4   : > { %p603_p0 = pnand %p602_p13, %p502_p12  ;;  %p609_p3 = scmp.lt.s32.totalorder %s607_s16, %s601_s24 }
 0x1b6   : > { %p604_p1 = pneg %p603_p0  ;;  %p610_p4 = por %p609_p3, %p608_p2 }
 0x1b8   : > { %p611_p5 = pnand %p610_p4, %p604_p1 }
 0x1ba   : > { %614 = shalt.err (!%p611_p5)
}
 0x1bb   : > { %s615_s9 = scalar_lea.hbm %s841_s6, %s831_s28  ;;  %s619_s17 = scalar_lea.hbm %s890_s3, 1152 }
 0x1bc   : > { %p616_p7 = scmp.ne.s32.totalorder %s841_s6, %s615_s9  ;;  %p620_p10 = scmp.lt.u32.totalorder %s841_s6, %s890_s3 }
 0x1bd   : > { %p621_p11 = scmp.lt.u32.totalorder %s619_s17, %s615_s9  ;;  %p623_p0 = scmp.lt.u32.totalorder %s615_s9, %s841_s6 }
 0x1be   : > { %p617_p8 = pnand %p616_p7, %p502_p12 }
 0x1bf   : > { %p622_p13 = por %p621_p11, %p620_p10 }
 0x1c0   : > { %p618_p9 = pneg %p617_p8 }
 0x1c1   : > { %p624_p1 = por %p623_p0, %p622_p13 }
 0x1c3   : > { %p625_p2 = pnand %p624_p1, %p618_p9 }
 0x1c5   : > { %628 = shalt.err (!%p625_p2)
}
 0x1c6   : > { %s668_s25 = smov 128   ;;  %s669_s27 = smov 8  }
 0x1c7   : > { %432 = dma.vmem_to_hbm [thread:$0]  (%p502_p12), %s843_s4, %s831_s28, %s841_s6, %s826_s26, %s668_s25, %s668_s25, %s669_s27  }
 0x1c8 PF: > { %p550_p3 = scmp.ge.s32.totalorder %s663_s15, 2  ;;  %s441_s29 = sand.u32 1, %s651_s12  }
 0x1c9   : > { %s442_s30 = scalar_lea.sflag [#allocation3], %s441_s29 }
 0x1ca   : > { %p547_p4 = pnand %p550_p3, %p732_p6 }
 0x1cc   : > { %646 = dma.done.wait (!%p547_p4), %s442_s30, 640  }
 0x1cd   : > { %648 = vsyncadd (!%p547_p4), %s442_s30, 4294966656  ;;  %p13_p5 = scmp.ge.s32.totalorder %s715_s18, 4   ;;  %s893_s12 = smov %s655_s13 }
 0x1ce   : > { %s894_s13 = smov %s659_s14  ;;  %s895_s14 = smov %s726_s21 }
 0x1cf   : > { %s896_s15 = smov %s715_s18  ;;  %15 = sbr.rel (!%p13_p5) target bundleno = 3 (0x3), region = 67 }
 0x1d6   :  { %447 = vsyncpa [#allocation3], 1 }
 0x1d7   :  { %449 = vsyncpa [#allocation3 + $0x1], 1 }

</bundles_post_ra>
